<compile_context>
chip_gen: v5e
topology: v5e:2x2
jax: 0.10.0
libtpu: 0.0.40
codegen_flags: <defaults>
</compile_context>

<pallas_src>
import functools

import jax
import jax.numpy as jnp
from jax.experimental import pallas as pl
from jax.experimental.pallas import tpu as pltpu

INPUT_SIZE = 784
HIDDEN_SIZE = 128
OUTPUT_SIZE = 10

K_PAD = 896        # 7 * 128: zero-pad contraction dim to a lane multiple
OUT_PAD = 128      # lane-dense output block; sliced to 10 columns in the wrapper
DEFAULT_TB = 1024  # batch tile: bf16 x block = TB*896*2 B (~1.75 MiB), safe on v5e/v6e/v7x


def mlp_kernel(x_ref, w1_ref, b1_ref, w2_ref, b2_ref, o_ref):
    # fc1: (TB, 896) @ (896, 128) on the MXU, f32 accumulation; bias + ReLU in f32 (VPU).
    h = jnp.dot(x_ref[...], w1_ref[...], preferred_element_type=jnp.float32)
    h = jnp.maximum(h + b1_ref[...], 0.0)
    # fc2: (TB, 128) @ (128, 128) -- padded to full MXU width, unmasked (TB, 128) store.
    out = jnp.dot(h.astype(jnp.bfloat16), w2_ref[...],
                  preferred_element_type=jnp.float32)
    o_ref[...] = (out + b2_ref[...]).astype(o_ref.dtype)


def prepare_params(w1, b1, w2, b2):
    """One-time layout prep (keep off the per-call hot path).

    PyTorch nn.Linear stores (out_features, in_features); transpose to (in, out),
    zero-pad K -> 896 and N -> 128, and cast weights to bf16.
    """
    w1_t = jnp.transpose(w1)                                              # (784, 128)
    w1_p = jnp.zeros((K_PAD, HIDDEN_SIZE), jnp.float32).at[:INPUT_SIZE].set(w1_t)
    w2_t = jnp.transpose(w2)                                              # (128, 10)
    w2_p = jnp.zeros((HIDDEN_SIZE, OUT_PAD), jnp.float32).at[:, :OUTPUT_SIZE].set(w2_t)
    b1_p = b1.reshape(1, HIDDEN_SIZE).astype(jnp.float32)
    b2_p = jnp.zeros((1, OUT_PAD), jnp.float32).at[:, :OUTPUT_SIZE].set(
        b2.reshape(1, OUTPUT_SIZE))
    return w1_p.astype(jnp.bfloat16), b1_p, w2_p.astype(jnp.bfloat16), b2_p


@functools.partial(jax.jit, static_argnames=("tb",))
def simple_nn_forward(x, w1_p, b1_p, w2_p, b2_p, *, tb=DEFAULT_TB):
    """x: (B, 784) f32 (or bf16). Returns (B, 10) f32 logits."""
    B = x.shape[0]
    # Shrink the tile for small batches; keep it a multiple of 8 (sublane aligned).
    tb = min(tb, max(8, ((B + 7) // 8) * 8))
    b_pad = ((B + tb - 1) // tb) * tb

    # Zero-pad batch -> multiple of tb and K 784 -> 896; cast the streamed operand to bf16.
    x_p = jnp.zeros((b_pad, K_PAD), jnp.bfloat16)
    x_p = x_p.at[:B, :INPUT_SIZE].set(x.astype(jnp.bfloat16))

    out = pl.pallas_call(
        mlp_kernel,
        out_shape=jax.ShapeDtypeStruct((b_pad, OUT_PAD), jnp.float32),
        grid_spec=pltpu.PrefetchScalarGridSpec(
            num_scalar_prefetch=0,
            grid=(b_pad // tb,),
            in_specs=[
                # x streams per batch tile (double-buffered by the pipeline).
                pl.BlockSpec((tb, K_PAD), lambda i: (i, 0)),
                # Weights / biases: constant index_map -> stay resident in VMEM.
                pl.BlockSpec((K_PAD, HIDDEN_SIZE), lambda i: (0, 0)),
                pl.BlockSpec((1, HIDDEN_SIZE), lambda i: (0, 0)),
                pl.BlockSpec((HIDDEN_SIZE, OUT_PAD), lambda i: (0, 0)),
                pl.BlockSpec((1, OUT_PAD), lambda i: (0, 0)),
            ],
            out_specs=pl.BlockSpec((tb, OUT_PAD), lambda i: (i, 0)),
        ),
        compiler_params=pltpu.CompilerParams(
            dimension_semantics=("parallel",),      # megacore split on v7x; no-op v5e/v6e
            vmem_limit_bytes=64 * 1024 * 1024,      # headroom for larger tb sweeps
        ),
    )(x_p, w1_p, b1_p, w2_p, b2_p)

    return out[:B, :OUTPUT_SIZE]


def init_params(key):
    """Deterministic init mimicking PyTorch nn.Linear (uniform +-1/sqrt(fan_in))."""
    k1, k2, k3, k4 = jax.random.split(key, 4)
    bound1 = 1.0 / (INPUT_SIZE ** 0.5)
    bound2 = 1.0 / (HIDDEN_SIZE ** 0.5)
    w1 = jax.random.uniform(k1, (HIDDEN_SIZE, INPUT_SIZE), jnp.float32, -bound1, bound1)
    b1 = jax.random.uniform(k2, (HIDDEN_SIZE,), jnp.float32, -bound1, bound1)
    w2 = jax.random.uniform(k3, (OUTPUT_SIZE, HIDDEN_SIZE), jnp.float32, -bound2, bound2)
    b2 = jax.random.uniform(k4, (OUTPUT_SIZE,), jnp.float32, -bound2, bound2)
    return w1, b1, w2, b2


if __name__ == "__main__":
    key = jax.random.PRNGKey(0)
    k_params, k_x = jax.random.split(key)

    w1, b1, w2, b2 = init_params(k_params)
    batch = 8
    x = jax.random.normal(k_x, (batch, INPUT_SIZE), jnp.float32)

    params = prepare_params(w1, b1, w2, b2)          # one-time layout prep
    out = simple_nn_forward(x, *params)
    out = jax.block_until_ready(out)

    # Reference check in plain f32 JAX (same math as the PyTorch forward).
    # Tolerance loosened because the kernel uses bf16 operands with f32 accumulation.
    ref = jnp.maximum(x @ w1.T + b1, 0.0) @ w2.T + b2
    assert out.shape == (batch, OUTPUT_SIZE)
    assert jnp.allclose(out, ref, atol=5e-2, rtol=5e-2), float(jnp.max(jnp.abs(out - ref)))

    print("KERNEL_OK")
</pallas_src>

<mosaic_0001>
module attributes {stable_mosaic.version = 11 : i64} {
  func.func @mlp_kernel(%arg0: i32, %arg1: memref<8x896xbf16, #tpu.memory_space<vmem>>, %arg2: memref<896x128xbf16, #tpu.memory_space<vmem>>, %arg3: memref<1x128xf32, #tpu.memory_space<vmem>>, %arg4: memref<128x128xbf16, #tpu.memory_space<vmem>>, %arg5: memref<1x128xf32, #tpu.memory_space<vmem>>, %arg6: memref<8x128xf32, #tpu.memory_space<vmem>>) attributes {dimension_semantics = [#tpu.dimension_semantics<parallel>], iteration_bounds = array<i64: 1>, scalar_prefetch = 0 : i64, scratch_operands = 0 : i64, tpu.core_type = #tpu.core_type<tc>, window_params = [{transform_indices = @transform_0, window_bounds = array<i64: 8, 896>}, {pipeline_mode = #tpu.pipeline_mode<synchronous>, transform_indices = @transform_1, window_bounds = array<i64: 896, 128>}, {pipeline_mode = #tpu.pipeline_mode<synchronous>, transform_indices = @transform_2, window_bounds = array<i64: 1, 128>}, {pipeline_mode = #tpu.pipeline_mode<synchronous>, transform_indices = @transform_3, window_bounds = array<i64: 128, 128>}, {pipeline_mode = #tpu.pipeline_mode<synchronous>, transform_indices = @transform_4, window_bounds = array<i64: 1, 128>}, {transform_indices = @transform_5, window_bounds = array<i64: 8, 128>}]} {
    %c0 = arith.constant 0 : index
    %c0_0 = arith.constant 0 : index
    %0 = vector.load %arg1[%c0, %c0_0] : memref<8x896xbf16, #tpu.memory_space<vmem>>, vector<8x896xbf16>
    %c0_1 = arith.constant 0 : index
    %c0_2 = arith.constant 0 : index
    %1 = vector.load %arg2[%c0_1, %c0_2] : memref<896x128xbf16, #tpu.memory_space<vmem>>, vector<896x128xbf16>
    %cst = arith.constant dense<0.000000e+00> : vector<8x128xf32>
    %2 = tpu.matmul %0, %1, %cst {dimension_numbers = #tpu.dot_dimension_numbers<[1], [0], [0], [1], [0, 0, 1, 1], [], []>} : vector<8x896xbf16>, vector<896x128xbf16>, vector<8x128xf32> -> vector<8x128xf32>
    %c0_3 = arith.constant 0 : index
    %c0_4 = arith.constant 0 : index
    %3 = vector.load %arg3[%c0_3, %c0_4] : memref<1x128xf32, #tpu.memory_space<vmem>>, vector<1x128xf32>
    %4 = vector.broadcast %3 : vector<1x128xf32> to vector<8x128xf32>
    %5 = arith.addf %2, %4 : vector<8x128xf32>
    %cst_5 = arith.constant 0.000000e+00 : f32
    %6 = vector.broadcast %cst_5 : f32 to vector<8x128xf32>
    %7 = arith.maximumf %5, %6 : vector<8x128xf32>
    %8 = arith.truncf %7 : vector<8x128xf32> to vector<8x128xbf16>
    %c0_6 = arith.constant 0 : index
    %c0_7 = arith.constant 0 : index
    %9 = vector.load %arg4[%c0_6, %c0_7] : memref<128x128xbf16, #tpu.memory_space<vmem>>, vector<128x128xbf16>
    %cst_8 = arith.constant dense<0.000000e+00> : vector<8x128xf32>
    %10 = tpu.matmul %8, %9, %cst_8 {dimension_numbers = #tpu.dot_dimension_numbers<[1], [0], [0], [1], [0, 0, 1, 1], [], []>} : vector<8x128xbf16>, vector<128x128xbf16>, vector<8x128xf32> -> vector<8x128xf32>
    %c0_9 = arith.constant 0 : index
    %c0_10 = arith.constant 0 : index
    %11 = vector.load %arg5[%c0_9, %c0_10] : memref<1x128xf32, #tpu.memory_space<vmem>>, vector<1x128xf32>
    %12 = vector.broadcast %11 : vector<1x128xf32> to vector<8x128xf32>
    %13 = arith.addf %10, %12 : vector<8x128xf32>
    %c0_11 = arith.constant 0 : index
    %c0_12 = arith.constant 0 : index
    %14 = vector.load %arg6[%c0_11, %c0_12] : memref<8x128xf32, #tpu.memory_space<vmem>>, vector<8x128xf32>
    tpu.vector_store %arg6[%c0_11, %c0_12], %13 {strides = array<i32>} : memref<8x128xf32, #tpu.memory_space<vmem>>, vector<8x128xf32>,
    return
  }
  func.func @transform_0(%arg0: i32) -> (i32, i32) {
    %c0_i32 = arith.constant 0 : i32
    %c0_i32_0 = arith.constant 0 : i32
    return %arg0, %c0_i32 : i32, i32
  }
  func.func @transform_1(%arg0: i32) -> (i32, i32) {
    %c0_i32 = arith.constant 0 : i32
    %c0_i32_0 = arith.constant 0 : i32
    %c0_i32_1 = arith.constant 0 : i32
    return %c0_i32, %c0_i32_0 : i32, i32
  }
  func.func @transform_2(%arg0: i32) -> (i32, i32) {
    %c0_i32 = arith.constant 0 : i32
    %c0_i32_0 = arith.constant 0 : i32
    %c0_i32_1 = arith.constant 0 : i32
    return %c0_i32, %c0_i32_0 : i32, i32
  }
  func.func @transform_3(%arg0: i32) -> (i32, i32) {
    %c0_i32 = arith.constant 0 : i32
    %c0_i32_0 = arith.constant 0 : i32
    %c0_i32_1 = arith.constant 0 : i32
    return %c0_i32, %c0_i32_0 : i32, i32
  }
  func.func @transform_4(%arg0: i32) -> (i32, i32) {
    %c0_i32 = arith.constant 0 : i32
    %c0_i32_0 = arith.constant 0 : i32
    %c0_i32_1 = arith.constant 0 : i32
    return %c0_i32, %c0_i32_0 : i32, i32
  }
  func.func @transform_5(%arg0: i32) -> (i32, i32) {
    %c0_i32 = arith.constant 0 : i32
    %c0_i32_0 = arith.constant 0 : i32
    return %arg0, %c0_i32 : i32, i32
  }
}

</mosaic_0001>

<bundles_post_ra>
// kernel: simple_nn_forward.1
= control target key start
LH: loop header
LB: loop body
LE: loop exit
PB: predicated region body
PF: predicated region fallthrough
CT: control target
= control target key end

     0   :  { %10 = vsyncpa [#allocation3], 0  ;;  %s1170_s0 = inlined_call_operand.vmem [shape: bf16[8,896], index: 0, kind: input, shape index: {}]   ;;  %s1171_s1 = inlined_call_operand.hbm [shape: bf16[896,128], index: 1, kind: input, shape index: {}]   ;;  %s1172_s2 = inlined_call_operand.vmem [shape: f32[1,128], index: 2, kind: input, shape index: {}]   ;;  %s1173_s3 = inlined_call_operand.vmem [shape: bf16[128,128], index: 3, kind: input, shape index: {}]   ;;  %s1174_s4 = inlined_call_operand.vmem [shape: f32[1,128], index: 4, kind: input, shape index: {}]   ;;  %s1175_s5 = inlined_call_operand.hbm [shape: f32[8,128], index: 5, kind: output, shape index: {}]  }
   0x1   :  { %11 = vsyncpa [#allocation4], 0  ;;  %s18_s20 = sshll.u32 %s1171_s1, 4  ;;  %s1088_s21 = smov [#allocation2]   ;;  %s19_s20 = int_to_ptr.hbm [resolvable:$true] %s18_s20 }
   0x2   :  { %s20_s22 = sshll.u32 %s1088_s21, 4  ;;  %s1089_s23 = smov 64   ;;  %s21_s22 = int_to_ptr.vmem [resolvable:$true] %s20_s22 }
   0x3   :  { %s1090_s24 = smov 4  }
   0x4   :  { %26 = dma.hbm_to_vmem [thread:$0]  %s19_s20, 7168, %s21_s22, [#allocation3], %s1089_s23, %s1089_s23, %s1090_s24  }
   0x5   :  { %1084 = dma.done.wait [#allocation3], 7168  }
   0x6   :  { %1085 = vsyncadd [#allocation3], 4294960128  ;;  %v973_v0 = vld [vmem:[#allocation2 + $0x38] sm:$0xff]  ;;  %v972_v3 = vld [vmem:[#allocation2 + $0x30] sm:$0xff]  ;;  %s1091_s24 = smov [#allocation5]   ;;  %s700_s27 = sshll.u32 %s1175_s5, 4  ;;  %s701_s27 = int_to_ptr.hbm [resolvable:$true] %s700_s27 }
   0x7   :  { %v981_v1 = vld [vmem:[#allocation2 + $0x78] sm:$0xff]  ;;  %518 = vmatpush.bf16.msra.mxu0 %v973_v0  ;;  %v980_v4 = vld [vmem:[#allocation2 + $0x70] sm:$0xff]  ;;  %v971_v7 = vld [vmem:[#allocation2 + $0x28] sm:$0xff]  ;;  %s698_s1 = sshll.u32 %s1091_s24, 4  ;;  %s699_s1 = int_to_ptr.vmem [resolvable:$true] %s698_s1 }
   0x8   :  { %v989_v2 = vld [vmem:[#allocation2 + $0xb8] sm:$0xff]  ;;  %531 = vmatpush.bf16.msra.mxu1 %v981_v1  ;;  %v988_v5 = vld [vmem:[#allocation2 + $0xb0] sm:$0xff]  ;;  %v979_v8 = vld [vmem:[#allocation2 + $0x68] sm:$0xff] }
   0x9   :  { %544 = vmatpush.bf16.msra.mxu2 %v989_v2  ;;  %v997_v6 = vld [vmem:[#allocation2 + $0xf8] sm:$0xff]  ;;  %v987_v9 = vld [vmem:[#allocation2 + $0xa8] sm:$0xff]  ;;  %v996_v10 = vld [vmem:[#allocation2 + $0xf0] sm:$0xff] }
   0xa   :  { %557 = vmatpush.bf16.msra.mxu3 %v997_v6  ;;  %v970_v11 = vld [vmem:[#allocation2 + $0x20] sm:$0xff]  ;;  %v995_v14 = vld [vmem:[#allocation2 + $0xe8] sm:$0xff]  ;;  %v969_v15 = vld [vmem:[#allocation2 + $0x18] sm:$0xff] }
   0xb   :  { %519 = vmatpush.bf16.msra.mxu0 %v972_v3  ;;  %v978_v12 = vld [vmem:[#allocation2 + $0x60] sm:$0xff]  ;;  %v977_v16 = vld [vmem:[#allocation2 + $0x58] sm:$0xff]  ;;  %v968_v19 = vld [vmem:[#allocation2 + $0x10] sm:$0xff] }
   0xc   :  { %532 = vmatpush.bf16.msra.mxu1 %v980_v4  ;;  %v986_v13 = vld [vmem:[#allocation2 + $0xa0] sm:$0xff]  ;;  %v985_v17 = vld [vmem:[#allocation2 + $0x98] sm:$0xff]  ;;  %v976_v20 = vld [vmem:[#allocation2 + $0x50] sm:$0xff] }
   0xd   :  { %545 = vmatpush.bf16.msra.mxu2 %v988_v5  ;;  %v994_v18 = vld [vmem:[#allocation2 + $0xe0] sm:$0xff]  ;;  %v984_v21 = vld [vmem:[#allocation2 + $0x90] sm:$0xff]  ;;  %v993_v22 = vld [vmem:[#allocation2 + $0xd8] sm:$0xff] }
   0xe   :  { %558 = vmatpush.bf16.msra.mxu3 %v996_v10  ;;  %v967_v23 = vld [vmem:[#allocation2 + $0x8] sm:$0xff]  ;;  %v37_v25 = vld [vmem:[%s1170_s0] sm:$0xff]  ;;  %v992_v27 = vld [vmem:[#allocation2 + $0xd0] sm:$0xff] }
   0xf   :  { %520 = vmatpush.bf16.msra.mxu0 %v971_v7  ;;  %v975_v24 = vld [vmem:[#allocation2 + $0x48] sm:$0xff]  ;;  %v161_v29 = vunpack.c.l.b16 %v37_v25  ;;  %v966_v30 = vld [vmem:[#allocation2] sm:$0xff]  ;;  %v162_v33 = vunpack.c.h.b16 %v37_v25  ;;  %v1005_v35 = vld [vmem:[#allocation2 + $0x138] sm:$0xff] }
  0x10   :  { %533 = vmatpush.bf16.msra.mxu1 %v979_v8  ;;  %v983_v26 = vld [vmem:[#allocation2 + $0x88] sm:$0xff]  ;;  %v974_v31 = vld [vmem:[#allocation2 + $0x40] sm:$0xff]  ;;  %v1013_v36 = vld [vmem:[#allocation2 + $0x178] sm:$0xff] }
  0x11   :  { %546 = vmatpush.bf16.msra.mxu2 %v987_v9  ;;  %v38_v28 = vld [vmem:[%s1170_s0 + $0x8] sm:$0xff]  ;;  %v982_v34 = vld [vmem:[#allocation2 + $0x80] sm:$0xff]  ;;  %v1021_v37 = vld [vmem:[#allocation2 + $0x1b8] sm:$0xff]  ;;  %v168_v38 = vpack.c.b16 %v161_v29, %v161_v29  ;;  %v169_v41 = vpack.c.b16 %v162_v33, %v162_v33 }
  0x12   :  { %559 = vmatpush.bf16.msra.mxu3 %v995_v14  ;;  %v163_v32 = vunpack.c.l.b16 %v38_v28  ;;  %v991_v39 = vld [vmem:[#allocation2 + $0xc8] sm:$0xff]  ;;  %v1004_v42 = vld [vmem:[#allocation2 + $0x130] sm:$0xff]  ;;  %v990_v45 = vld [vmem:[#allocation2 + $0xc0] sm:$0xff]  ;;  %v164_v46 = vunpack.c.h.b16 %v38_v28 }
  0x13   :  { %521 = vmatpush.bf16.msra.mxu0 %v970_v11  ;;  %v1012_v43 = vld [vmem:[#allocation2 + $0x170] sm:$0xff]  ;;  %v1003_v47 = vld [vmem:[#allocation2 + $0x128] sm:$0xff]  ;;  %v1002_v51 = vld [vmem:[#allocation2 + $0x120] sm:$0xff] }
  0x14   :  { %534 = vmatpush.bf16.msra.mxu1 %v978_v12  ;;  %v170_v40 = vpack.c.b16 %v163_v32, %v163_v32  ;;  %v1020_v44 = vld [vmem:[#allocation2 + $0x1b0] sm:$0xff]  ;;  %v1011_v48 = vld [vmem:[#allocation2 + $0x168] sm:$0xff]  ;;  %v171_v50 = vpack.c.b16 %v164_v46, %v164_v46  ;;  %v1010_v52 = vld [vmem:[#allocation2 + $0x160] sm:$0xff] }
  0x15   :  { %547 = vmatpush.bf16.msra.mxu2 %v986_v13  ;;  %v1019_v49 = vld [vmem:[#allocation2 + $0x1a8] sm:$0xff]  ;;  %v1018_v53 = vld [vmem:[#allocation2 + $0x1a0] sm:$0xff]  ;;  %v1001_v54 = vld [vmem:[#allocation2 + $0x118] sm:$0xff] }
  0x16   :  { %560 = vmatpush.bf16.msra.mxu3 %v994_v18  ;;  %v1009_v55 = vld [vmem:[#allocation2 + $0x158] sm:$0xff]  ;;  %v1000_v57 = vld [vmem:[#allocation2 + $0x110] sm:$0xff]  ;;  %v999_v60 = vld [vmem:[#allocation2 + $0x108] sm:$0xff] }
  0x17   :  { %522 = vmatpush.bf16.msra.mxu0 %v969_v15  ;;  %v1017_v56 = vld [vmem:[#allocation2 + $0x198] sm:$0xff]  ;;  %v1008_v58 = vld [vmem:[#allocation2 + $0x150] sm:$0xff]  ;;  %v1007_v62 = vld [vmem:[#allocation2 + $0x148] sm:$0xff] }
  0x18   :  { %535 = vmatpush.bf16.msra.mxu1 %v977_v16  ;;  %v1016_v59 = vld [vmem:[#allocation2 + $0x190] sm:$0xff]  ;;  %v1015_v63 = vld [vmem:[#allocation2 + $0x188] sm:$0xff]  ;;  %v40_v0 = vld [vmem:[%s1170_s0 + $0x18] sm:$0xf] }
  0x19   :  { %548 = vmatpush.bf16.msra.mxu2 %v985_v17  ;;  %v39_v61 = vld [vmem:[%s1170_s0 + $0x10] sm:$0xff]  ;;  %v998_v2 = vld [vmem:[#allocation2 + $0x100] sm:$0xff]  ;;  %v167_v4 = vunpack.c.l.b16 %v40_v0  ;;  %v1029_v10 = vld [vmem:[%s1173_s3 + $0x38] sm:$0xff] }
  0x1a   :  { %561 = vmatpush.bf16.msra.mxu3 %v993_v22  ;;  %v165_v1 = vunpack.c.l.b16 %v39_v61  ;;  %v166_v3 = vunpack.c.h.b16 %v39_v61  ;;  %v1006_v5 = vld [vmem:[#allocation2 + $0x140] sm:$0xff]  ;;  %v1028_v11 = vld [vmem:[%s1173_s3 + $0x30] sm:$0xff]  ;;  %v1027_v12 = vld [vmem:[%s1173_s3 + $0x28] sm:$0xff] }
  0x1b   :  { %523 = vmatpush.bf16.msra.mxu0 %v968_v19  ;;  %v1014_v6 = vld [vmem:[#allocation2 + $0x180] sm:$0xff]  ;;  %v174_v9 = vpack.c.b16 %v167_v4, %v167_v4  ;;  %v1025_v14 = vld [vmem:[%s1173_s3 + $0x18] sm:$0xff]  ;;  %v1024_v15 = vld [vmem:[%s1173_s3 + $0x10] sm:$0xff] }
  0x1c   :  { %536 = vmatpush.bf16.msra.mxu1 %v976_v20  ;;  %v172_v7 = vpack.c.b16 %v165_v1, %v165_v1  ;;  %v173_v8 = vpack.c.b16 %v166_v3, %v166_v3  ;;  %v1026_v13 = vld [vmem:[%s1173_s3 + $0x20] sm:$0xff]  ;;  %v1023_v18 = vld [vmem:[%s1173_s3 + $0x8] sm:$0xff] }
  0x1d   :  { %549 = vmatpush.bf16.msra.mxu2 %v984_v21  ;;  %v1022_v19 = vld [vmem:[%s1173_s3] sm:$0xff] }
  0x1e   :  { %562 = vmatpush.bf16.msra.mxu3 %v992_v27 }
  0x1f   :  { %524 = vmatpush.bf16.msra.mxu0 %v967_v23  ;;  %v1034_v23 = vld [vmem:[%s1172_s2] ss:$0 sm:$0xff] }
  0x20   :  { %537 = vmatpush.bf16.msra.mxu1 %v975_v24 }
  0x21   :  { %550 = vmatpush.bf16.msra.mxu2 %v983_v26 }
  0x22   :  { %563 = vmatpush.bf16.msra.mxu3 %v991_v39 }
  0x23   :  { %525 = vmatpush.bf16.msra.mxu0 %v966_v30 }
  0x24   :  { %538 = vmatpush.bf16.msra.mxu1 %v974_v31 }
  0x25   :  { %551 = vmatpush.bf16.msra.mxu2 %v982_v34 }
  0x26   :  { %526 = vmatmul.bf16.vlgmr.msra.gmra.mxu0 %v168_v38  ;;  %564 = vmatpush.bf16.msra.mxu3 %v990_v45 }
  0x27   :  { %570 = vmatpush.bf16.msrb.mxu0 %v1005_v35  ;;  %539 = vmatmul.bf16.vlgmr.msra.gmra.mxu1 %v169_v41 }
  0x28   :  { %583 = vmatpush.bf16.msrb.mxu1 %v1013_v36  ;;  %552 = vmatmul.bf16.vlgmr.msra.gmra.mxu2 %v170_v40 }
  0x29   :  { %596 = vmatpush.bf16.msrb.mxu2 %v1021_v37  ;;  %565 = vmatmul.bf16.vlgmr.msra.gmra.mxu3 %v171_v50 }
  0x2a   :  { %679 = vmatpush.bf16.msrb.mxu3 %v1029_v10 }
  0x2b   :  { %571 = vmatpush.bf16.msrb.mxu0 %v1004_v42  ;;  %v1035_v42 = vld [vmem:[%s1174_s4] ss:$0 sm:$0xff] }
  0x2c   :  { %584 = vmatpush.bf16.msrb.mxu1 %v1012_v43 }
  0x2d   :  { %597 = vmatpush.bf16.msrb.mxu2 %v1020_v44 }
  0x2e   :  { %680 = vmatpush.bf16.msrb.mxu3 %v1028_v11 }
  0x2f   :  { %572 = vmatpush.bf16.msrb.mxu0 %v1003_v47 }
  0x30   :  { %585 = vmatpush.bf16.msrb.mxu1 %v1011_v48 }
  0x31   :  { %598 = vmatpush.bf16.msrb.mxu2 %v1019_v49 }
  0x32   :  { %681 = vmatpush.bf16.msrb.mxu3 %v1027_v12 }
  0x33   :  { %573 = vmatpush.bf16.msrb.mxu0 %v1002_v51 }
  0x34   :  { %586 = vmatpush.bf16.msrb.mxu1 %v1010_v52 }
  0x35   :  { %599 = vmatpush.bf16.msrb.mxu2 %v1018_v53 }
  0x36   :  { %682 = vmatpush.bf16.msrb.mxu3 %v1026_v13 }
  0x37   :  { %574 = vmatpush.bf16.msrb.mxu0 %v1001_v54 }
  0x38   :  { %587 = vmatpush.bf16.msrb.mxu1 %v1009_v55 }
  0x39   :  { %600 = vmatpush.bf16.msrb.mxu2 %v1017_v56 }
  0x3a   :  { %683 = vmatpush.bf16.msrb.mxu3 %v1025_v14 }
  0x3b   :  { %575 = vmatpush.bf16.msrb.mxu0 %v1000_v57 }
  0x3c   :  { %588 = vmatpush.bf16.msrb.mxu1 %v1008_v58 }
  0x3d   :  { %601 = vmatpush.bf16.msrb.mxu2 %v1016_v59 }
  0x3e   :  { %684 = vmatpush.bf16.msrb.mxu3 %v1024_v15 }
  0x3f   :  { %576 = vmatpush.bf16.msrb.mxu0 %v999_v60 }
  0x40   :  { %589 = vmatpush.bf16.msrb.mxu1 %v1007_v62 }
  0x41   :  { %602 = vmatpush.bf16.msrb.mxu2 %v1015_v63 }
  0x42   :  { %685 = vmatpush.bf16.msrb.mxu3 %v1023_v18 }
  0x43   :  { %577 = vmatpush.bf16.msrb.mxu0 %v998_v2 }
  0x44   :  { %590 = vmatpush.bf16.msrb.mxu1 %v1006_v5 }
  0x45   :  { %603 = vmatpush.bf16.msrb.mxu2 %v1014_v6 }
  0x46   :  { %578 = vmatmul.bf16.vlgmr.msrb.gmra.mxu0 %v172_v7  ;;  %686 = vmatpush.bf16.msrb.mxu3 %v1022_v19 }
  0x47   :  { %591 = vmatmul.bf16.vlgmr.msrb.gmra.mxu1 %v173_v8 }
  0x48   :  { %604 = vmatmul.bf16.vlgmr.msrb.gmra.mxu2 %v174_v9 }
  0xa3   :  { %v527_v16 = vpop.f32.mrf.mxu0 }
  0xa4   :  { %v540_v17 = vpop.f32.mrf.mxu1  ;;  %v528_v26 = vadd.f32 %v1034_v23, %v527_v16 }
  0xa6   :  { %v541_v27 = vadd.f32 %v540_v17, %v528_v26 }
  0xab   :  { %v553_v20 = vpop.f32.mrf.mxu2  ;;  %v529_v21 = vpop.f32.mrf.mxu0 }
  0xac   :  { %v542_v22 = vpop.f32.mrf.mxu1  ;;  %v566_v24 = vpop.f32.mrf.mxu3  ;;  %v554_v29 = vadd.f32 %v553_v20, %v541_v27 }
  0xae   :  { %v567_v30 = vadd.f32 %v566_v24, %v554_v29 }
  0xb3   :  { %v555_v25 = vpop.f32.mrf.mxu2 }
  0xb4   :  { %v568_v28 = vpop.f32.mrf.mxu3 }
  0xc3   :  { %v579_v31 = vpop.f32.mrf.mxu0 }
  0xc4   :  { %v592_v32 = vpop.f32.mrf.mxu1  ;;  %v580_v33 = vadd.f32 %v579_v31, %v567_v30 }
  0xc6   :  { %v593_v34 = vadd.f32 %v592_v32, %v580_v33 }
  0xcb   :  { %v605_v35 = vpop.f32.mrf.mxu2  ;;  %v581_v37 = vpop.f32.mrf.mxu0 }
  0xcc   :  { %v606_v36 = vadd.f32 %v605_v35, %v593_v34  ;;  %v594_v38 = vpop.f32.mrf.mxu1 }
  0xce   :  { %v609_v39 = vmax.f32 %v606_v36, 0.0 }
  0xd0   :  { %v610_v40 = vpack.c.bf16 %v609_v39, %v609_v39 }
  0xd2   :  { %687 = vmatmul.bf16.vlgmr.msrb.gmra.mxu3 %v610_v40 }
  0xd3   :  { %v607_v41 = vpop.f32.mrf.mxu2 }
 0x155   :  { %v688_v43 = vpop.f32.mrf.mxu3 }
 0x156   :  { %v689_v44 = vadd.f32 %v1035_v42, %v688_v43 }
 0x158   :  { %692 = vst [vmem:[#allocation5] sm:$0xff] %v689_v44 }
 0x159   :  { %703 = dma.vmem_to_hbm [thread:$0]  %s699_s1, 128, %s701_s27, [#allocation4]  }
 0x15d   :  { %v690_v45 = vpop.f32.mrf.mxu3 }
 0x15e   :  { %1086 = dma.done.wait [#allocation4], 128  }
 0x15f   :  { %1087 = vsyncadd [#allocation4], 4294967168 }
 0x160   :  { %708 = vsyncpa [#allocation3], 1 }
 0x161   :  { %709 = vsyncpa [#allocation4], 1 }

</bundles_post_ra>
